<compile_context>
chip_gen: v6e
topology: v6e:2x2x1
jax: 0.10.0
libtpu: 0.0.40
codegen_flags: <defaults>
</compile_context>

<pallas_src>
import functools

import jax
import jax.numpy as jnp
from jax.experimental import pallas as pl
from jax.experimental.pallas import tpu as pltpu

BN_EPS = 1e-5
LANE = 128
MAX_TC = 2048  # cap per-step weight tile width


def _round_up(x, m):
    return (x + m - 1) // m * m


def _vmem_capacity_bytes():
    try:
        return int(pltpu.get_tpu_info().vmem_capacity_bytes)
    except Exception:
        return 64 << 20  # conservative (v7x per-TensorCore)


def classblock_kernel(x_ref, gb_ref, w_ref, out_ref, y_ref, *, n_true):
    # x_ref:   (Np, Dp)  f32       — full (padded) batch, constant block
    # gb_ref:  (2, Dp)   f32       — row 0 = gamma, row 1 = beta
    # w_ref:   (Dp, tC)  mm_dtype  — classifier weight tile (PyTorch weight.T)
    # out_ref: (Np, tC)  f32
    # y_ref:   (Np, Dp)  mm_dtype  — VMEM scratch, BN output (persists per core)

    @pl.when(pl.program_id(1) == 0)
    def _():
        # BatchNorm1d with batch statistics, computed once per core.
        x = x_ref[...]
        np_rows = x.shape[0]
        inv_n = 1.0 / n_true

        mean = jnp.sum(x, axis=0, keepdims=True) * inv_n          # (1, Dp)
        xc = x - mean
        if np_rows != n_true:
            # Zero out padded batch rows so they don't perturb the variance
            # (padded rows are already zero in x, but xc = -mean there).
            rmask = (jax.lax.broadcasted_iota(jnp.int32, (np_rows, 1), 0)
                     < n_true).astype(x.dtype)
            xc = xc * rmask
        # Two-pass (centered) biased variance: numerically safe, no
        # E[x^2]-mean^2 cancellation.
        var = jnp.sum(xc * xc, axis=0, keepdims=True) * inv_n     # (1, Dp)
        inv_std = jax.lax.rsqrt(var + BN_EPS)                     # (1, Dp)

        gb = gb_ref[...]
        y = xc * (gb[0:1, :] * inv_std) + gb[1:2, :]              # (Np, Dp) f32
        y_ref[...] = y.astype(y_ref.dtype)

    # Linear (no bias) on the MXU: one full-width matmul + plain store per tile.
    out_ref[...] = jnp.dot(
        y_ref[...], w_ref[...], preferred_element_type=jnp.float32
    ).astype(out_ref.dtype)


def class_block_forward(x, gamma, beta, w_t, *, mm_dtype=jnp.float32):
    """ClassBlock forward: BatchNorm1d (batch stats) -> Linear(no bias).

    x: (N, D) f32, gamma/beta: (D,) f32, w_t: (D, C) f32 (PyTorch weight.T).
    mm_dtype: jnp.float32 (bit-faithful) or jnp.bfloat16 (full-rate MXU and
              half the weight HBM traffic; BN output is quantized to bf16
              before the matmul — documented precision tradeoff).
    Returns (N, C) f32.
    """
    N, D = x.shape
    C = w_t.shape[1]
    mm_dtype = jnp.dtype(mm_dtype)
    w_itemsize = mm_dtype.itemsize

    Dp = _round_up(D, LANE)
    sub = 8 if w_itemsize >= 4 else 16            # sublane multiple for scratch
    Np = _round_up(N, sub)

    # --- Lane/sublane-dense padding. Padded D columns: x=0, gamma=1, beta=0,
    #     W rows=0 -> contribute nothing and produce no NaNs (var=0 -> rsqrt(eps)).
    xf = jnp.pad(x.astype(jnp.float32), ((0, Np - N), (0, Dp - D)))
    gb = jnp.stack([
        jnp.pad(gamma.astype(jnp.float32), (0, Dp - D), constant_values=1.0),
        jnp.pad(beta.astype(jnp.float32), (0, Dp - D), constant_values=0.0),
    ])

    # --- Size tC from the real VMEM budget. ---
    cap = _vmem_capacity_bytes()
    budget = int(cap * 0.7)
    # Resident: x (counted double-buffered to be safe even though its index is
    # constant), gamma/beta, and the y scratch.
    resident = 4 * (2 * Np * Dp + 2 * 2 * Dp) + Np * Dp * w_itemsize
    # Per column of tC: double-buffered W tile + double-buffered f32 out tile.
    per_col = 2 * Dp * w_itemsize + 2 * Np * 4
    tc_budget = max((budget - resident) // per_col, LANE)
    tC = int(min(tc_budget, MAX_TC, _round_up(C, LANE)))
    tC = max((tC // LANE) * LANE, LANE)

    n_ct = -(-C // tC)
    n_outer = 2 if n_ct >= 2 else 1               # v7x: 2 TCs split the outer axis
    if n_ct % n_outer:
        n_ct += 1
    n_inner = n_ct // n_outer
    Cp = n_ct * tC

    wf = jnp.pad(w_t, ((0, Dp - D), (0, Cp - C))).astype(mm_dtype)

    # --- VMEM limit: actual footprint + headroom, capped below capacity. ---
    footprint = resident + tC * per_col
    vmem_limit = int(min(max(footprint + (4 << 20), 16 << 20), int(cap * 0.9)))

    flops = 2 * Np * Dp * Cp + 8 * Np * Dp
    bytes_accessed = 4 * (Np * Dp + 2 * Dp + Np * Cp) + w_itemsize * Dp * Cp

    out_p = pl.pallas_call(
        functools.partial(classblock_kernel, n_true=N),
        out_shape=jax.ShapeDtypeStruct((Np, Cp), jnp.float32),
        grid_spec=pltpu.PrefetchScalarGridSpec(
            num_scalar_prefetch=0,
            grid=(n_outer, n_inner),
            in_specs=[
                pl.BlockSpec((Np, Dp), lambda i, j: (0, 0)),   # x (resident)
                pl.BlockSpec((2, Dp), lambda i, j: (0, 0)),    # gamma/beta
                pl.BlockSpec((Dp, tC),
                             lambda i, j: (0, i * n_inner + j)),  # W tile
            ],
            out_specs=pl.BlockSpec((Np, tC),
                                   lambda i, j: (0, i * n_inner + j)),
            scratch_shapes=[pltpu.VMEM((Np, Dp), mm_dtype)],   # BN output
        ),
        compiler_params=pltpu.CompilerParams(
            dimension_semantics=("parallel", "arbitrary"),
            vmem_limit_bytes=vmem_limit,
        ),
        cost_estimate=pl.CostEstimate(
            flops=flops, transcendentals=Dp, bytes_accessed=bytes_accessed),
    )(xf, gb, wf)

    # TODO(synk): for very large D, tile the reduction axis with a VMEM f32
    # accumulator and pl.when init/finalize instead of a single D block.
    return out_p[:N, :C]


def reference_forward(x, gamma, beta, w_t):
    # Pure-JAX reference (matches PyTorch BatchNorm1d training-mode forward).
    mean = jnp.mean(x, axis=0, keepdims=True)
    var = jnp.mean((x - mean) ** 2, axis=0, keepdims=True)
    y = (x - mean) / jnp.sqrt(var + BN_EPS) * gamma[None, :] + beta[None, :]
    return y @ w_t


if __name__ == "__main__":
    key = jax.random.PRNGKey(0)
    k_x, k_w = jax.random.split(key)

    # Small shapes consistent with the module: (batch, input_dim) -> (batch, num_classes)
    N, D, C = 8, 32, 16

    x = jax.random.normal(k_x, (N, D), dtype=jnp.float32)

    # BatchNorm1d params after weights_init_kaiming: weight=1, bias=0.
    gamma = jnp.ones((D,), dtype=jnp.float32)
    beta = jnp.zeros((D,), dtype=jnp.float32)

    # Linear(D, C, bias=False) weight ~ N(0, std=0.001); PyTorch shape (C, D),
    # stored transposed here as (D, C).
    w = 0.001 * jax.random.normal(k_w, (C, D), dtype=jnp.float32)
    w_t = w.T

    ref = reference_forward(x, gamma, beta, w_t)

    # Faithful f32 path.
    out = jax.block_until_ready(class_block_forward(x, gamma, beta, w_t))
    assert out.shape == (N, C)
    assert jnp.allclose(out, ref, atol=1e-5, rtol=1e-5), "f32 mismatch vs reference"

    # bf16-MXU path (bf16 weights + bf16 BN output, f32 accumulation) —
    # exercises the N-padding/mask path too (Np=16).  Looser tolerance.
    out_bf16 = jax.block_until_ready(
        class_block_forward(x, gamma, beta, w_t, mm_dtype=jnp.bfloat16))
    assert out_bf16.shape == (N, C)
    assert jnp.allclose(out_bf16, ref, atol=1e-3, rtol=5e-2), "bf16 mismatch vs reference"

    print("KERNEL_OK")
</pallas_src>

<mosaic_0001>
module attributes {stable_mosaic.version = 11 : i64} {
  func.func @classblock_kernel(%arg0: i32, %arg1: i32, %arg2: memref<8x128xf32, #tpu.memory_space<vmem>>, %arg3: memref<2x128xf32, #tpu.memory_space<vmem>>, %arg4: memref<128x128xf32, #tpu.memory_space<vmem>>, %arg5: memref<8x128xf32, #tpu.memory_space<vmem>>, %arg6: memref<8x128xf32, #tpu.memory_space<vmem>>) attributes {dimension_semantics = [#tpu.dimension_semantics<parallel>, #tpu.dimension_semantics<arbitrary>], iteration_bounds = array<i64: 1, 1>, scalar_prefetch = 0 : i64, scratch_operands = 1 : i64, tpu.core_type = #tpu.core_type<tc>, window_params = [{pipeline_mode = #tpu.pipeline_mode<synchronous>, transform_indices = @transform_0, window_bounds = array<i64: 8, 128>}, {pipeline_mode = #tpu.pipeline_mode<synchronous>, transform_indices = @transform_1, window_bounds = array<i64: 2, 128>}, {transform_indices = @transform_2, window_bounds = array<i64: 128, 128>}, {transform_indices = @transform_3, window_bounds = array<i64: 8, 128>}]} {
    %c0_i32 = arith.constant 0 : i32
    %0 = arith.cmpi eq, %arg1, %c0_i32 : i32
    %1 = arith.extui %0 : i1 to i32
    %c0_i32_0 = arith.constant 0 : i32
    %2 = arith.cmpi ne, %1, %c0_i32_0 : i32
    scf.if %2 {
      %c0_6 = arith.constant 0 : index
      %c0_7 = arith.constant 0 : index
      %7 = vector.load %arg2[%c0_6, %c0_7] : memref<8x128xf32, #tpu.memory_space<vmem>>, vector<8x128xf32>
      %cst_8 = arith.constant dense<0.000000e+00> : vector<128xf32>
      %8 = vector.multi_reduction <add>, %7, %cst_8 [0] : vector<8x128xf32> to vector<128xf32>
      %9 = vector.shape_cast %8 : vector<128xf32> to vector<1x128xf32>
      %cst_9 = arith.constant 1.250000e-01 : f32
      %10 = vector.broadcast %cst_9 : f32 to vector<1x128xf32>
      %11 = arith.mulf %9, %10 : vector<1x128xf32>
      %12 = vector.broadcast %11 : vector<1x128xf32> to vector<8x128xf32>
      %13 = arith.subf %7, %12 : vector<8x128xf32>
      %14 = arith.mulf %13, %13 : vector<8x128xf32>
      %cst_10 = arith.constant dense<0.000000e+00> : vector<128xf32>
      %15 = vector.multi_reduction <add>, %14, %cst_10 [0] : vector<8x128xf32> to vector<128xf32>
      %16 = vector.shape_cast %15 : vector<128xf32> to vector<1x128xf32>
      %cst_11 = arith.constant 1.250000e-01 : f32
      %17 = vector.broadcast %cst_11 : f32 to vector<1x128xf32>
      %18 = arith.mulf %16, %17 : vector<1x128xf32>
      %cst_12 = arith.constant 9.99999974E-6 : f32
      %19 = vector.broadcast %cst_12 : f32 to vector<1x128xf32>
      %20 = arith.addf %18, %19 : vector<1x128xf32>
      %21 = math.rsqrt %20 : vector<1x128xf32>
      %c0_13 = arith.constant 0 : index
      %c0_14 = arith.constant 0 : index
      %22 = vector.load %arg3[%c0_13, %c0_14] : memref<2x128xf32, #tpu.memory_space<vmem>>, vector<2x128xf32>
      %23 = vector.extract_strided_slice %22 {offsets = [0, 0], sizes = [1, 128], strides = [1, 1]} : vector<2x128xf32> to vector<1x128xf32>
      %24 = arith.mulf %23, %21 : vector<1x128xf32>
      %25 = vector.broadcast %24 : vector<1x128xf32> to vector<8x128xf32>
      %26 = arith.mulf %13, %25 : vector<8x128xf32>
      %27 = vector.extract_strided_slice %22 {offsets = [1, 0], sizes = [1, 128], strides = [1, 1]} : vector<2x128xf32> to vector<1x128xf32>
      %28 = vector.broadcast %27 : vector<1x128xf32> to vector<8x128xf32>
      %29 = arith.addf %26, %28 : vector<8x128xf32>
      %c0_15 = arith.constant 0 : index
      %c0_16 = arith.constant 0 : index
      %30 = vector.load %arg6[%c0_15, %c0_16] : memref<8x128xf32, #tpu.memory_space<vmem>>, vector<8x128xf32>
      tpu.vector_store %arg6[%c0_15, %c0_16], %29 {strides = array<i32>} : memref<8x128xf32, #tpu.memory_space<vmem>>, vector<8x128xf32>,
    } else {
    }
    %c0 = arith.constant 0 : index
    %c0_1 = arith.constant 0 : index
    %3 = vector.load %arg6[%c0, %c0_1] : memref<8x128xf32, #tpu.memory_space<vmem>>, vector<8x128xf32>
    %c0_2 = arith.constant 0 : index
    %c0_3 = arith.constant 0 : index
    %4 = vector.load %arg4[%c0_2, %c0_3] : memref<128x128xf32, #tpu.memory_space<vmem>>, vector<128x128xf32>
    %cst = arith.constant dense<0.000000e+00> : vector<8x128xf32>
    %5 = tpu.matmul %3, %4, %cst {dimension_numbers = #tpu.dot_dimension_numbers<[1], [0], [0], [1], [0, 0, 1, 1], [], []>} : vector<8x128xf32>, vector<128x128xf32>, vector<8x128xf32> -> vector<8x128xf32>
    %c0_4 = arith.constant 0 : index
    %c0_5 = arith.constant 0 : index
    %6 = vector.load %arg5[%c0_4, %c0_5] : memref<8x128xf32, #tpu.memory_space<vmem>>, vector<8x128xf32>
    tpu.vector_store %arg5[%c0_4, %c0_5], %5 {strides = array<i32>} : memref<8x128xf32, #tpu.memory_space<vmem>>, vector<8x128xf32>,
    return
  }
  func.func @transform_0(%arg0: i32, %arg1: i32) -> (i32, i32) {
    %c0_i32 = arith.constant 0 : i32
    %c0_i32_0 = arith.constant 0 : i32
    %c0_i32_1 = arith.constant 0 : i32
    return %c0_i32, %c0_i32_0 : i32, i32
  }
  func.func @transform_1(%arg0: i32, %arg1: i32) -> (i32, i32) {
    %c0_i32 = arith.constant 0 : i32
    %c0_i32_0 = arith.constant 0 : i32
    %c0_i32_1 = arith.constant 0 : i32
    return %c0_i32, %c0_i32_0 : i32, i32
  }
  func.func @transform_2(%arg0: i32, %arg1: i32) -> (i32, i32) {
    %c1_i32 = arith.constant 1 : i32
    %0 = arith.muli %arg0, %c1_i32 : i32
    %1 = arith.addi %0, %arg1 : i32
    %c0_i32 = arith.constant 0 : i32
    %c0_i32_0 = arith.constant 0 : i32
    return %c0_i32, %1 : i32, i32
  }
  func.func @transform_3(%arg0: i32, %arg1: i32) -> (i32, i32) {
    %c1_i32 = arith.constant 1 : i32
    %0 = arith.muli %arg0, %c1_i32 : i32
    %1 = arith.addi %0, %arg1 : i32
    %c0_i32 = arith.constant 0 : i32
    %c0_i32_0 = arith.constant 0 : i32
    return %c0_i32, %1 : i32, i32
  }
}

</mosaic_0001>

<bundles_post_ra>
// kernel: tpu_custom_call.1
= control target key start
LH: loop header
LB: loop body
LE: loop exit
PB: predicated region body
PF: predicated region fallthrough
CT: control target
= control target key end

     0   :  { %8 = vsyncpa [#allocation4], 0  ;;  %s388_s0 = inlined_call_operand.hbm [shape: f32[8,128], index: 0, kind: input, shape index: {}]   ;;  %s389_s1 = inlined_call_operand.hbm [shape: f32[2,128], index: 1, kind: input, shape index: {}]   ;;  %s390_s2 = inlined_call_operand.hbm [shape: f32[128,128], index: 2, kind: input, shape index: {}]   ;;  %s391_s3 = inlined_call_operand.hbm [shape: f32[8,128], index: 3, kind: output, shape index: {}]  }
   0x1   :  { %9 = vsyncpa [#allocation7], 0 }
   0x2   :  { %10 = vsyncpa [#allocation5], 0  ;;  %s348_s12 = smov [#allocation6]   ;;  %s349_s14 = smov [#allocation3]  }
   0x3   :  { %s27_s13 = sshll.u32 %s348_s12, 4  ;;  %s17_s15 = sshll.u32 %s349_s14, 4  ;;  %s28_s13 = int_to_ptr.vmem [resolvable:$true] %s27_s13  ;;  %s18_s15 = int_to_ptr.vmem [resolvable:$true] %s17_s15 }
   0x4   :  { %s270_s16 = scalar_lea.vmem %s28_s13, 32  ;;  %p275_p1 = scmp.lt.s32.totalorder %s28_s13, %s28_s13 }
   0x5   :  { %p271_p0 = scmp.ne.s32.totalorder %s28_s13, %s270_s16  ;;  %p276_p2 = scmp.lt.s32.totalorder %s270_s16, %s270_s16 }
   0x7   :  { %p277_p3 = por %p276_p2, %p275_p1 }
   0x9   :  { %p278_p4 = pnand %p277_p3, %p271_p0 }
   0xb   :  { %281 = shalt.err (!%p278_p4)
}
   0xc   :  { %30 = dma.hbm_to_vmem [thread:$0]  %s389_s1, 32, %s28_s13, [#allocation7]  }
   0xd   :  { %s290_s19 = scalar_lea.vmem %s18_s15, 128  ;;  %p295_p6 = scmp.lt.s32.totalorder %s18_s15, %s18_s15 }
   0xe   :  { %p291_p5 = scmp.ne.s32.totalorder %s18_s15, %s290_s19  ;;  %p296_p7 = scmp.lt.s32.totalorder %s290_s19, %s290_s19 }
  0x10   :  { %p297_p8 = por %p296_p7, %p295_p6 }
  0x12   :  { %p298_p9 = pnand %p297_p8, %p291_p5 }
  0x14   :  { %301 = shalt.err (!%p298_p9)
}
  0x15   :  { %20 = dma.hbm_to_vmem [thread:$0]  %s388_s0, 128, %s18_s15, [#allocation4]  }
  0x16   :  { %s350_s22 = smov [#allocation8]  }
  0x17   :  { %s39_s23 = sshll.u32 %s350_s22, 4  ;;  %s40_s23 = int_to_ptr.vmem [resolvable:$true] %s39_s23 }
  0x18   :  { %s310_s24 = scalar_lea.vmem %s40_s23, 2048  ;;  %p315_p11 = scmp.lt.s32.totalorder %s40_s23, %s40_s23 }
  0x19   :  { %p311_p10 = scmp.ne.s32.totalorder %s40_s23, %s310_s24  ;;  %p316_p12 = scmp.lt.s32.totalorder %s310_s24, %s310_s24 }
  0x1b   :  { %p317_p13 = por %p316_p12, %p315_p11 }
  0x1d   :  { %p318_p0 = pnand %p317_p13, %p311_p10 }
  0x1f   :  { %321 = shalt.err (!%p318_p0)
}
  0x20   :  { %s351_s1 = smov 128   ;;  %s352_s25 = smov 8  }
  0x21   :  { %45 = dma.hbm_to_vmem [thread:$0]  %s390_s2, 2048, %s40_s23, [#allocation7], %s351_s1, %s351_s1, %s352_s25  }
  0x22   :  { %342 = dma.done.wait [#allocation4], 128  }
  0x23   :  { %343 = vsyncadd [#allocation4], 4294967168 }
  0x24   :  { %344 = dma.done.wait [#allocation7], 2080  }
  0x25   :  { %345 = vsyncadd [#allocation7], 4294965216  ;;  %v353_v0 = vmov 0.0   ;;  %vm354_vm0 = vmmov 0   ;;  %v109_v1 = vld [vmem:[#allocation8 + $0x78] sm:$0xff]  ;;  %v108_v2 = vld [vmem:[#allocation8 + $0x70] sm:$0xff]  ;;  %v82_v35 = vlaneseq }
  0x26   :  { %217 = vmatprep.subr.mxu0 %v353_v0  ;;  %249 = vmatprep.mubr.msk.f32.mxu0 %vm354_vm0, %v353_v0  ;;  %v107_v3 = vld [vmem:[#allocation8 + $0x68] sm:$0xff]  ;;  %v106_v4 = vld [vmem:[#allocation8 + $0x60] sm:$0xff]  ;;  %v61_v5 = vld [vmem:[#allocation3] sm:$0xff]  ;;  %s355_s0 = smov [#allocation9]  }
  0x27   :  { %218 = vmatpush3.msra.mxu0 %v109_v1  ;;  %v105_v6 = vld [vmem:[#allocation8 + $0x58] sm:$0xff]  ;;  %v62_v7 = vrot.slane %v61_v5, 4  ;;  %v104_v8 = vld [vmem:[#allocation8 + $0x50] sm:$0xff]  ;;  %v103_v10 = vld [vmem:[#allocation8 + $0x48] sm:$0xff]  ;;  %v83_v36 = vshrl.u32 %v82_v35, 7  ;;  %s190_s2 = sshll.u32 %s355_s0, 4  ;;  %s191_s2 = int_to_ptr.vmem [resolvable:$true] %s190_s2 }
  0x28   :  { %219 = vmatprep.subr.mxu0 %v353_v0  ;;  %v102_v12 = vld [vmem:[#allocation8 + $0x40] sm:$0xff]  ;;  %v101_v14 = vld [vmem:[#allocation8 + $0x38] sm:$0xff]  ;;  %v100_v16 = vld [vmem:[#allocation8 + $0x30] sm:$0xff]  ;;  %s322_s28 = scalar_lea.vmem %s191_s2, 128  ;;  %p327_p2 = scmp.lt.s32.totalorder %s191_s2, %s191_s2 }
  0x29   :  { %220 = vmatpush3.msra.mxu0 %v108_v2  ;;  %v63_v9 = vadd.f32 %v62_v7, %v61_v5  ;;  %v99_v18 = vld [vmem:[#allocation8 + $0x28] sm:$0xff]  ;;  %v98_v20 = vld [vmem:[#allocation8 + $0x20] sm:$0xff]  ;;  %v97_v22 = vld [vmem:[#allocation8 + $0x18] sm:$0xff]  ;;  %v84_v38 = vsub.s32 0, %v83_v36  ;;  %v89_v39 = vsub.s32 1, %v83_v36  ;;  %p323_p1 = scmp.ne.s32.totalorder %s191_s2, %s322_s28  ;;  %p328_p3 = scmp.lt.s32.totalorder %s322_s28, %s322_s28 }
  0x2a   :  { %221 = vmatprep.subr.mxu0 %v353_v0  ;;  %v96_v24 = vld [vmem:[#allocation8 + $0x10] sm:$0xff]  ;;  %v95_v26 = vld [vmem:[#allocation8 + $0x8] sm:$0xff]  ;;  %v94_v28 = vld [vmem:[#allocation8] sm:$0xff] }
  0x2b   :  { %222 = vmatpush3.msra.mxu0 %v107_v3  ;;  %v64_v11 = vrot.slane %v63_v9, 2  ;;  %v80_v37 = vld [vmem:[#allocation6] sm:$0x3]  ;;  %p329_p4 = por %p328_p3, %p327_p2 }
  0x2c   :  { %223 = vmatprep.subr.mxu0 %v353_v0  ;;  %v90_v43 = vrot.slane %v80_v37, %v89_v39 }
  0x2d   :  { %224 = vmatpush3.msra.mxu0 %v106_v4  ;;  %v65_v13 = vadd.f32 %v64_v11, %v63_v9  ;;  %p330_p5 = pnand %p329_p4, %p323_p1 }
  0x2e   :  { %225 = vmatprep.subr.mxu0 %v353_v0 }
  0x2f   :  { %226 = vmatpush3.msra.mxu0 %v105_v6  ;;  %v66_v15 = vrot.slane %v65_v13, 1 }
  0x30   :  { %227 = vmatprep.subr.mxu0 %v353_v0 }
  0x31   :  { %228 = vmatpush3.msra.mxu0 %v104_v8  ;;  %v67_v17 = vadd.f32 %v66_v15, %v65_v13 }
  0x32   :  { %229 = vmatprep.subr.mxu0 %v353_v0 }
  0x33   :  { %230 = vmatpush3.msra.mxu0 %v103_v10  ;;  %v68_v19 = vmul.f32 0.125, %v67_v17 }
  0x34   :  { %231 = vmatprep.subr.mxu0 %v353_v0 }
  0x35   :  { %232 = vmatpush3.msra.mxu0 %v102_v12  ;;  %v69_v21 = vsub.f32 %v61_v5, %v68_v19 }
  0x36   :  { %233 = vmatprep.subr.mxu0 %v353_v0 }
  0x37   :  { %234 = vmatpush3.msra.mxu0 %v101_v14  ;;  %v70_v23 = vmul.f32 %v69_v21, %v69_v21 }
  0x38   :  { %235 = vmatprep.subr.mxu0 %v353_v0 }
  0x39   :  { %236 = vmatpush3.msra.mxu0 %v100_v16  ;;  %v71_v25 = vrot.slane %v70_v23, 4 }
  0x3a   :  { %237 = vmatprep.subr.mxu0 %v353_v0 }
  0x3b   :  { %238 = vmatpush3.msra.mxu0 %v99_v18  ;;  %v72_v27 = vadd.f32 %v71_v25, %v70_v23 }
  0x3c   :  { %239 = vmatprep.subr.mxu0 %v353_v0 }
  0x3d   :  { %240 = vmatpush3.msra.mxu0 %v98_v20  ;;  %v73_v29 = vrot.slane %v72_v27, 2 }
  0x3e   :  { %241 = vmatprep.subr.mxu0 %v353_v0 }
  0x3f   :  { %242 = vmatpush3.msra.mxu0 %v97_v22  ;;  %v74_v30 = vadd.f32 %v73_v29, %v72_v27 }
  0x40   :  { %243 = vmatprep.subr.mxu0 %v353_v0 }
  0x41   :  { %244 = vmatpush3.msra.mxu0 %v96_v24  ;;  %v75_v31 = vrot.slane %v74_v30, 1 }
  0x42   :  { %245 = vmatprep.subr.mxu0 %v353_v0 }
  0x43   :  { %246 = vmatpush3.msra.mxu0 %v95_v26  ;;  %v76_v32 = vadd.f32 %v75_v31, %v74_v30 }
  0x44   :  { %247 = vmatprep.subr.mxu0 %v353_v0 }
  0x45   :  { %248 = vmatpush3.msra.mxu0 %v94_v28  ;;  %v77_v33 = vmul.f32 0.125, %v76_v32 }
  0x47   :  { %v78_v34 = vadd.f32 1e-05, %v77_v33 }
  0x49   :  { %260 = vrsqrt.f32 %v78_v34 }
  0x56   :  { %v261_v40 = vpop.eup %260 }
  0x57   :  { %v81_v41 = vmul.f32 %v261_v40, %v80_v37 }
  0x59   :  { %v85_v42 = vrot.slane %v81_v41, %v84_v38 }
  0x5b   :  { %v86_v44 = vmul.f32 %v85_v42, %v69_v21 }
  0x5d   :  { %v91_v45 = vadd.f32 %v90_v43, %v86_v44 }
  0x5f   :  { %250 = vmatmul.mubr.f32.vlgmr.msra.gmra.mxu0 %v91_v45 }
 0x11f   :  { %v176_v46 = vpop.f32.mrf.mxu0 }
 0x120   :  { %180 = vst [vmem:[#allocation9] sm:$0xff] %v176_v46 }
 0x121   :  { %v251_v47 = vpop.f32.mrf.mxu0 }
 0x122   :  { %333 = shalt.err (!%p330_p5)
}
 0x123   :  { %193 = dma.vmem_to_hbm [thread:$0]  %s191_s2, 128, %s391_s3, [#allocation5]  }
 0x124   :  { %346 = dma.done.wait [#allocation5], 128  }
 0x125   :  { %347 = vsyncadd [#allocation5], 4294967168 }
 0x126   :  { %197 = vsyncpa [#allocation4], 1 }
 0x127   :  { %198 = vsyncpa [#allocation7], 1 }
 0x128   :  { %199 = vsyncpa [#allocation5], 1 }

</bundles_post_ra>
